<compile_context>
chip_gen: v7x
topology: tpu7x:2x2x1
jax: 0.10.0
libtpu: 0.0.40
codegen_flags: <defaults>
</compile_context>

<pallas_src>
import jax
import jax.numpy as jnp
import numpy as np
from jax import lax
from jax.experimental import pallas as pl
from jax.experimental.pallas import tpu as pltpu

# ---- model hyper-parameters (from RecurrentGCN.__init__) ----
N_NODES = 16          # number_of_nodes
NODE_FEATURES = 4     # node_features
OUT_CHANNELS = 2      # AGCRN out_channels
K = 2                 # Chebyshev order
EMB_DIM = 4           # embedding_dimensions
BATCH = 2

CIN = NODE_FEATURES + OUT_CHANNELS    # 6 (AVWGCN input channels = F + O)


def agcrn_kernel(x_ref, h_ref, e_ref, wg_ref, wu_ref, wl_ref, bl_ref, out_ref):
    X = x_ref[...]            # (B, N, F)
    H = h_ref[...]            # (B, N, O)
    E = e_ref[...]            # (N, D)
    Wg = wg_ref[...]          # (2*CIN + 1, D * 2O)  packed gate pool
    Wu = wu_ref[...]          # (2*CIN + 1, D * O)   packed update pool
    B, N, F = X.shape
    O = H.shape[-1]
    D = E.shape[-1]

    # ---------- batch-invariant work (single-shot kernel: runs exactly once) ----------
    # Adaptive adjacency A = softmax(relu(E @ E^T), axis=1)
    logits = lax.dot_general(E, E, dimension_numbers=(((1,), (1,)), ((), ())),
                             preferred_element_type=jnp.float32)        # (N, N)
    logits = jnp.maximum(logits, 0.0)
    ex = jnp.exp(logits - jnp.max(logits, axis=1, keepdims=True))
    A = ex / jnp.sum(ex, axis=1, keepdims=True)
    A_b = jnp.broadcast_to(A[None], (B, N, N))                          # shared over batch
    E_b = jnp.broadcast_to(E[None], (B, N, D))                          # for the d-contraction

    def bmm(lhs, w2d):
        # (B, N, c) x (c, p) with the weight broadcast across batch -> (B, N, p)  [MXU]
        wb = jnp.broadcast_to(w2d[None], (B,) + w2d.shape)
        return jnp.einsum('bnc,bcp->bnp', lhs, wb, preferred_element_type=jnp.float32)

    def avwgcn(Xp, Hp, AXp, AHp, W, cout):
        # W rows: [X @ k=0 (F) | H @ k=0 (O) | X @ k=1 (F) | H @ k=1 (O) | bias (1)]
        # W cols: flattened (d, o) as d*cout + o.
        T = jnp.broadcast_to(W[2 * (F + O):, :][None], (B, N, D * cout))   # bias row
        T = T + bmm(Xp,  W[:F, :])
        T = T + bmm(Hp,  W[F:F + O, :])
        T = T + bmm(AXp, W[F + O:2 * F + O, :])
        T = T + bmm(AHp, W[2 * F + O:2 * (F + O), :])
        # contract the embedding dimension: out[b,n,o] = sum_d E[n,d] * T[b,n,d*cout+o]
        acc = jnp.zeros((B, N, cout), jnp.float32)
        for d in range(D):
            acc = acc + E_b[:, :, d:d + 1] * T[:, :, d * cout:(d + 1) * cout]
        return acc

    # ---------- per-batch work (batched, single shot) ----------
    AX = jnp.einsum('bnm,bmf->bnf', A_b, X, preferred_element_type=jnp.float32)   # reused
    AH = jnp.einsum('bnm,bmf->bnf', A_b, H, preferred_element_type=jnp.float32)

    # Gate: Z_R = sigmoid(AVWGCN([X, H]))
    ZR = jax.nn.sigmoid(avwgcn(X, H, AX, AH, Wg, 2 * O))                 # (B, N, 2O)
    Z, R = ZR[:, :, :O], ZR[:, :, O:]

    # Candidate: HC = tanh(AVWGCN([X, Z*H]))   (torch_geometric_temporal ordering)
    ZH = Z * H
    AZH = jnp.einsum('bnm,bmf->bnf', A_b, ZH, preferred_element_type=jnp.float32)
    HC = jnp.tanh(avwgcn(X, ZH, AX, AZH, Wu, O))                         # (B, N, O)

    # GRU update: H_new = R*H + (1-R)*HC
    H_new = R * H + (1.0 - R) * HC                                       # (B, N, O)

    # Head: y = Linear(relu(H_new)) — VPU multiply-add with SMEM scalars.
    relu_h = jnp.maximum(H_new, 0.0)
    y = jnp.zeros((B, N, 1), jnp.float32) + bl_ref[0, 0]
    for o in range(O):
        y = y + relu_h[:, :, o:o + 1] * wl_ref[0, o]

    # Packed output slab: [:, :, :O] = h_0, [:, :, O] = y
    out_ref[:, :, :O] = H_new
    out_ref[:, :, O:O + 1] = y


def recurrent_gcn_forward(x, e, h, params):
    B, N, _ = x.shape
    O = h.shape[-1]
    wg_all, wu_all, wl, bl = params

    vmem = pl.BlockSpec(memory_space=pltpu.MemorySpace.VMEM)
    smem = pl.BlockSpec(memory_space=pltpu.MemorySpace.SMEM)

    out = pl.pallas_call(
        agcrn_kernel,
        out_shape=jax.ShapeDtypeStruct((B, N, O + 1), jnp.float32),
        in_specs=[vmem, vmem, vmem, vmem, vmem, smem, smem],
        out_specs=vmem,
    )(x, h, e, wg_all, wu_all, wl, bl)

    y = out[:, :, O:O + 1]
    h0 = out[:, :, :O]
    return y, h0


def pack_avwgcn(wpool, bpool):
    """Pack (D,K,CIN,cout) weights_pool + (D,cout) bias_pool into a (2*CIN+1, D*cout) matrix.

    Row layout: [X@k=0 (F rows) | H@k=0 (O rows) | X@k=1 (F rows) | H@k=1 (O rows) | bias (1)].
    Column p = d*cout + o holds wpool[d, k, i, o] (or bpool[d, o] for the bias row).
    Pure wrapper-side layout plumbing — the kernel only row-slices this operand.
    """
    D, _, _, cout = wpool.shape
    F = NODE_FEATURES
    wx0 = jnp.transpose(wpool[:, 0, :F, :], (1, 0, 2)).reshape(F, D * cout)
    wh0 = jnp.transpose(wpool[:, 0, F:, :], (1, 0, 2)).reshape(-1, D * cout)
    wx1 = jnp.transpose(wpool[:, 1, :F, :], (1, 0, 2)).reshape(F, D * cout)
    wh1 = jnp.transpose(wpool[:, 1, F:, :], (1, 0, 2)).reshape(-1, D * cout)
    brow = bpool.reshape(1, D * cout)
    return jnp.concatenate([wx0, wh0, wx1, wh1, brow], axis=0)


# ---- pure-JAX reference (mirrors torch_geometric_temporal AGCRN semantics) ----
def reference(x, e, h, wg_pool, bg_pool, wu_pool, bu_pool, w_lin, b_lin):
    N = e.shape[0]
    A = jax.nn.softmax(jnp.maximum(e @ e.T, 0.0), axis=1)
    supports = jnp.stack([jnp.eye(N, dtype=jnp.float32), A], axis=0)

    def avwgcn(Xc, wpool, bpool):
        W = jnp.einsum("nd,dkio->nkio", e, wpool)
        bias = e @ bpool
        XG = jnp.einsum("knm,bmc->bknc", supports, Xc)
        XG = jnp.transpose(XG, (0, 2, 1, 3))
        return jnp.einsum("bnki,nkio->bno", XG, W) + bias

    XH = jnp.concatenate([x, h], axis=-1)
    ZR = jax.nn.sigmoid(avwgcn(XH, wg_pool, bg_pool))
    Z, R = ZR[..., :OUT_CHANNELS], ZR[..., OUT_CHANNELS:]
    C = jnp.concatenate([x, Z * h], axis=-1)
    HC = jnp.tanh(avwgcn(C, wu_pool, bu_pool))
    H_new = R * h + (1.0 - R) * HC
    y = jnp.maximum(H_new, 0.0) @ w_lin.T + b_lin
    return y, H_new


if __name__ == "__main__":
    key = jax.random.PRNGKey(0)
    keys = jax.random.split(key, 9)

    x = jax.random.normal(keys[0], (BATCH, N_NODES, NODE_FEATURES), jnp.float32)
    e = jax.random.normal(keys[1], (N_NODES, EMB_DIM), jnp.float32)
    h = jax.random.normal(keys[2], (BATCH, N_NODES, OUT_CHANNELS), jnp.float32)

    # Deterministic synthetic parameters (shapes follow AVWGCN / Linear __init__).
    wg_pool = 0.3 * jax.random.normal(keys[3], (EMB_DIM, K, CIN, 2 * OUT_CHANNELS), jnp.float32)
    bg_pool = 0.1 * jax.random.normal(keys[4], (EMB_DIM, 2 * OUT_CHANNELS), jnp.float32)
    wu_pool = 0.3 * jax.random.normal(keys[5], (EMB_DIM, K, CIN, OUT_CHANNELS), jnp.float32)
    bu_pool = 0.1 * jax.random.normal(keys[6], (EMB_DIM, OUT_CHANNELS), jnp.float32)
    w_lin = 0.5 * jax.random.normal(keys[7], (1, OUT_CHANNELS), jnp.float32)   # Linear(2,1).weight
    b_lin = 0.1 * jax.random.normal(keys[8], (1,), jnp.float32)                # Linear(2,1).bias

    # Wrapper-side packing (layout plumbing only): one operand per AVWGCN, SMEM scalars for head.
    wg_all = pack_avwgcn(wg_pool, bg_pool)     # (13, 16)
    wu_all = pack_avwgcn(wu_pool, bu_pool)     # (13, 8)
    wl = w_lin                                 # (1, 2)  -> SMEM scalars
    bl = b_lin.reshape(1, 1)                   # (1, 1)  -> SMEM scalar

    y, h0 = recurrent_gcn_forward(x, e, h, (wg_all, wu_all, wl, bl))
    jax.block_until_ready((y, h0))

    y_ref, h_ref = reference(x, e, h, wg_pool, bg_pool, wu_pool, bu_pool, w_lin, b_lin)
    assert np.allclose(np.asarray(y), np.asarray(y_ref), rtol=1e-4, atol=1e-4)
    assert np.allclose(np.asarray(h0), np.asarray(h_ref), rtol=1e-4, atol=1e-4)
    print("KERNEL_OK")
</pallas_src>

<mosaic_0001>
module attributes {stable_mosaic.version = 11 : i64} {
  func.func @agcrn_kernel(%arg0: memref<2x16x4xf32, #tpu.memory_space<vmem>>, %arg1: memref<2x16x2xf32, #tpu.memory_space<vmem>>, %arg2: memref<16x4xf32, #tpu.memory_space<vmem>>, %arg3: memref<13x16xf32, #tpu.memory_space<vmem>>, %arg4: memref<13x8xf32, #tpu.memory_space<vmem>>, %arg5: memref<1x2xf32, #tpu.memory_space<smem>>, %arg6: memref<1x1xf32, #tpu.memory_space<smem>>, %arg7: memref<2x16x3xf32, #tpu.memory_space<vmem>>) attributes {dimension_semantics = [], scalar_prefetch = 0 : i64, scratch_operands = 0 : i64, tpu.core_type = #tpu.core_type<tc>} {
    %c0 = arith.constant 0 : index
    %c0_0 = arith.constant 0 : index
    %c0_1 = arith.constant 0 : index
    %0 = vector.load %arg0[%c0, %c0_0, %c0_1] : memref<2x16x4xf32, #tpu.memory_space<vmem>>, vector<2x16x4xf32>
    %c0_2 = arith.constant 0 : index
    %c0_3 = arith.constant 0 : index
    %c0_4 = arith.constant 0 : index
    %1 = vector.load %arg1[%c0_2, %c0_3, %c0_4] : memref<2x16x2xf32, #tpu.memory_space<vmem>>, vector<2x16x2xf32>
    %c0_5 = arith.constant 0 : index
    %c0_6 = arith.constant 0 : index
    %2 = vector.load %arg2[%c0_5, %c0_6] : memref<16x4xf32, #tpu.memory_space<vmem>>, vector<16x4xf32>
    %c0_7 = arith.constant 0 : index
    %c0_8 = arith.constant 0 : index
    %3 = vector.load %arg3[%c0_7, %c0_8] : memref<13x16xf32, #tpu.memory_space<vmem>>, vector<13x16xf32>
    %c0_9 = arith.constant 0 : index
    %c0_10 = arith.constant 0 : index
    %4 = vector.load %arg4[%c0_9, %c0_10] : memref<13x8xf32, #tpu.memory_space<vmem>>, vector<13x8xf32>
    %cst = arith.constant dense<0.000000e+00> : vector<16x16xf32>
    %5 = tpu.matmul %2, %2, %cst {dimension_numbers = #tpu.dot_dimension_numbers<[1], [1], [0], [0], [0, 0, 1, 0], [], []>} : vector<16x4xf32>, vector<16x4xf32>, vector<16x16xf32> -> vector<16x16xf32>
    %cst_11 = arith.constant 0.000000e+00 : f32
    %6 = vector.broadcast %cst_11 : f32 to vector<16x16xf32>
    %7 = arith.maximumf %5, %6 : vector<16x16xf32>
    %cst_12 = arith.constant dense<0xFF800000> : vector<16xf32>
    %8 = vector.multi_reduction <maximumf>, %7, %cst_12 [1] : vector<16x16xf32> to vector<16xf32>
    %9 = vector.shape_cast %8 : vector<16xf32> to vector<16x1xf32>
    %10 = vector.broadcast %9 : vector<16x1xf32> to vector<16x16xf32>
    %11 = arith.subf %7, %10 : vector<16x16xf32>
    %12 = math.exp %11 : vector<16x16xf32>
    %cst_13 = arith.constant dense<0.000000e+00> : vector<16xf32>
    %13 = vector.multi_reduction <add>, %12, %cst_13 [1] : vector<16x16xf32> to vector<16xf32>
    %14 = vector.shape_cast %13 : vector<16xf32> to vector<16x1xf32>
    %15 = vector.broadcast %14 : vector<16x1xf32> to vector<16x16xf32>
    %16 = arith.divf %12, %15 : vector<16x16xf32>
    %17 = vector.shape_cast %16 : vector<16x16xf32> to vector<1x16x16xf32>
    %18 = vector.shape_cast %17 : vector<1x16x16xf32> to vector<1x16x16xf32>
    %19 = vector.broadcast %18 : vector<1x16x16xf32> to vector<2x16x16xf32>
    %20 = vector.shape_cast %2 : vector<16x4xf32> to vector<1x16x4xf32>
    %21 = vector.shape_cast %20 : vector<1x16x4xf32> to vector<1x16x4xf32>
    %22 = vector.broadcast %21 : vector<1x16x4xf32> to vector<2x16x4xf32>
    "tpu.trace_start"() <{level = 10 : i32, message = "bnm,bmf->bnf"}> : () -> ()
    %cst_14 = arith.constant dense<0.000000e+00> : vector<2x16x4xf32>
    %23 = tpu.matmul %19, %0, %cst_14 {dimension_numbers = #tpu.dot_dimension_numbers<[2], [1], [1], [2], [0, 0, 0, 1, 1, 2], [0], [0]>} : vector<2x16x16xf32>, vector<2x16x4xf32>, vector<2x16x4xf32> -> vector<2x16x4xf32>
    %cst_15 = arith.constant dense<0.000000e+00> : vector<2x16x2xf32>
    %24 = tpu.matmul %19, %1, %cst_15 {dimension_numbers = #tpu.dot_dimension_numbers<[2], [1], [1], [2], [0, 0, 0, 1, 1, 2], [0], [0]>} : vector<2x16x16xf32>, vector<2x16x2xf32>, vector<2x16x2xf32> -> vector<2x16x2xf32>
    "tpu.trace_stop"() : () -> ()
    %25 = vector.extract_strided_slice %3 {offsets = [12, 0], sizes = [1, 16], strides = [1, 1]} : vector<13x16xf32> to vector<1x16xf32>
    %26 = vector.shape_cast %25 : vector<1x16xf32> to vector<1x1x16xf32>
    %27 = vector.shape_cast %26 : vector<1x1x16xf32> to vector<1x1x16xf32>
    %28 = vector.broadcast %27 : vector<1x1x16xf32> to vector<2x16x16xf32>
    %29 = vector.extract_strided_slice %3 {offsets = [0, 0], sizes = [4, 16], strides = [1, 1]} : vector<13x16xf32> to vector<4x16xf32>
    %30 = vector.shape_cast %29 : vector<4x16xf32> to vector<1x4x16xf32>
    %31 = vector.shape_cast %30 : vector<1x4x16xf32> to vector<1x4x16xf32>
    %32 = vector.broadcast %31 : vector<1x4x16xf32> to vector<2x4x16xf32>
    "tpu.trace_start"() <{level = 10 : i32, message = "bnc,bcp->bnp"}> : () -> ()
    %cst_16 = arith.constant dense<0.000000e+00> : vector<2x16x16xf32>
    %33 = tpu.matmul %0, %32, %cst_16 {dimension_numbers = #tpu.dot_dimension_numbers<[2], [1], [1], [2], [0, 0, 0, 1, 1, 2], [0], [0]>} : vector<2x16x4xf32>, vector<2x4x16xf32>, vector<2x16x16xf32> -> vector<2x16x16xf32>
    "tpu.trace_stop"() : () -> ()
    %34 = arith.addf %28, %33 : vector<2x16x16xf32>
    %35 = vector.extract_strided_slice %3 {offsets = [4, 0], sizes = [2, 16], strides = [1, 1]} : vector<13x16xf32> to vector<2x16xf32>
    %36 = vector.shape_cast %35 : vector<2x16xf32> to vector<1x2x16xf32>
    %37 = vector.shape_cast %36 : vector<1x2x16xf32> to vector<1x2x16xf32>
    %38 = vector.broadcast %37 : vector<1x2x16xf32> to vector<2x2x16xf32>
    "tpu.trace_start"() <{level = 10 : i32, message = "bnc,bcp->bnp"}> : () -> ()
    %cst_17 = arith.constant dense<0.000000e+00> : vector<2x16x16xf32>
    %39 = tpu.matmul %1, %38, %cst_17 {dimension_numbers = #tpu.dot_dimension_numbers<[2], [1], [1], [2], [0, 0, 0, 1, 1, 2], [0], [0]>} : vector<2x16x2xf32>, vector<2x2x16xf32>, vector<2x16x16xf32> -> vector<2x16x16xf32>
    "tpu.trace_stop"() : () -> ()
    %40 = arith.addf %34, %39 : vector<2x16x16xf32>
    %41 = vector.extract_strided_slice %3 {offsets = [6, 0], sizes = [4, 16], strides = [1, 1]} : vector<13x16xf32> to vector<4x16xf32>
    %42 = vector.shape_cast %41 : vector<4x16xf32> to vector<1x4x16xf32>
    %43 = vector.shape_cast %42 : vector<1x4x16xf32> to vector<1x4x16xf32>
    %44 = vector.broadcast %43 : vector<1x4x16xf32> to vector<2x4x16xf32>
    "tpu.trace_start"() <{level = 10 : i32, message = "bnc,bcp->bnp"}> : () -> ()
    %cst_18 = arith.constant dense<0.000000e+00> : vector<2x16x16xf32>
    %45 = tpu.matmul %23, %44, %cst_18 {dimension_numbers = #tpu.dot_dimension_numbers<[2], [1], [1], [2], [0, 0, 0, 1, 1, 2], [0], [0]>} : vector<2x16x4xf32>, vector<2x4x16xf32>, vector<2x16x16xf32> -> vector<2x16x16xf32>
    "tpu.trace_stop"() : () -> ()
    %46 = arith.addf %40, %45 : vector<2x16x16xf32>
    %47 = vector.extract_strided_slice %3 {offsets = [10, 0], sizes = [2, 16], strides = [1, 1]} : vector<13x16xf32> to vector<2x16xf32>
    %48 = vector.shape_cast %47 : vector<2x16xf32> to vector<1x2x16xf32>
    %49 = vector.shape_cast %48 : vector<1x2x16xf32> to vector<1x2x16xf32>
    %50 = vector.broadcast %49 : vector<1x2x16xf32> to vector<2x2x16xf32>
    "tpu.trace_start"() <{level = 10 : i32, message = "bnc,bcp->bnp"}> : () -> ()
    %cst_19 = arith.constant dense<0.000000e+00> : vector<2x16x16xf32>
    %51 = tpu.matmul %24, %50, %cst_19 {dimension_numbers = #tpu.dot_dimension_numbers<[2], [1], [1], [2], [0, 0, 0, 1, 1, 2], [0], [0]>} : vector<2x16x2xf32>, vector<2x2x16xf32>, vector<2x16x16xf32> -> vector<2x16x16xf32>
    "tpu.trace_stop"() : () -> ()
    %52 = arith.addf %46, %51 : vector<2x16x16xf32>
    %cst_20 = arith.constant 0.000000e+00 : f32
    %53 = vector.broadcast %cst_20 : f32 to vector<2x16x4xf32>
    %54 = vector.extract_strided_slice %22 {offsets = [0, 0, 0], sizes = [2, 16, 1], strides = [1, 1, 1]} : vector<2x16x4xf32> to vector<2x16x1xf32>
    %55 = vector.extract_strided_slice %52 {offsets = [0, 0, 0], sizes = [2, 16, 4], strides = [1, 1, 1]} : vector<2x16x16xf32> to vector<2x16x4xf32>
    %56 = vector.broadcast %54 : vector<2x16x1xf32> to vector<2x16x4xf32>
    %57 = arith.mulf %56, %55 : vector<2x16x4xf32>
    %58 = arith.addf %53, %57 : vector<2x16x4xf32>
    %59 = vector.extract_strided_slice %22 {offsets = [0, 0, 1], sizes = [2, 16, 1], strides = [1, 1, 1]} : vector<2x16x4xf32> to vector<2x16x1xf32>
    %60 = vector.extract_strided_slice %52 {offsets = [0, 0, 4], sizes = [2, 16, 4], strides = [1, 1, 1]} : vector<2x16x16xf32> to vector<2x16x4xf32>
    %61 = vector.broadcast %59 : vector<2x16x1xf32> to vector<2x16x4xf32>
    %62 = arith.mulf %61, %60 : vector<2x16x4xf32>
    %63 = arith.addf %58, %62 : vector<2x16x4xf32>
    %64 = vector.extract_strided_slice %22 {offsets = [0, 0, 2], sizes = [2, 16, 1], strides = [1, 1, 1]} : vector<2x16x4xf32> to vector<2x16x1xf32>
    %65 = vector.extract_strided_slice %52 {offsets = [0, 0, 8], sizes = [2, 16, 4], strides = [1, 1, 1]} : vector<2x16x16xf32> to vector<2x16x4xf32>
    %66 = vector.broadcast %64 : vector<2x16x1xf32> to vector<2x16x4xf32>
    %67 = arith.mulf %66, %65 : vector<2x16x4xf32>
    %68 = arith.addf %63, %67 : vector<2x16x4xf32>
    %69 = vector.extract_strided_slice %22 {offsets = [0, 0, 3], sizes = [2, 16, 1], strides = [1, 1, 1]} : vector<2x16x4xf32> to vector<2x16x1xf32>
    %70 = vector.extract_strided_slice %52 {offsets = [0, 0, 12], sizes = [2, 16, 4], strides = [1, 1, 1]} : vector<2x16x16xf32> to vector<2x16x4xf32>
    %71 = vector.broadcast %69 : vector<2x16x1xf32> to vector<2x16x4xf32>
    %72 = arith.mulf %71, %70 : vector<2x16x4xf32>
    %73 = arith.addf %68, %72 : vector<2x16x4xf32>
    %74 = arith.negf %73 : vector<2x16x4xf32>
    %75 = math.exp %74 : vector<2x16x4xf32>
    %cst_21 = arith.constant 1.000000e+00 : f32
    %76 = vector.broadcast %cst_21 : f32 to vector<2x16x4xf32>
    %77 = arith.addf %76, %75 : vector<2x16x4xf32>
    %78 = arith.divf %76, %77 : vector<2x16x4xf32>
    %79 = vector.extract_strided_slice %78 {offsets = [0, 0, 0], sizes = [2, 16, 2], strides = [1, 1, 1]} : vector<2x16x4xf32> to vector<2x16x2xf32>
    %80 = vector.extract_strided_slice %78 {offsets = [0, 0, 2], sizes = [2, 16, 2], strides = [1, 1, 1]} : vector<2x16x4xf32> to vector<2x16x2xf32>
    %81 = arith.mulf %79, %1 : vector<2x16x2xf32>
    "tpu.trace_start"() <{level = 10 : i32, message = "bnm,bmf->bnf"}> : () -> ()
    %cst_22 = arith.constant dense<0.000000e+00> : vector<2x16x2xf32>
    %82 = tpu.matmul %19, %81, %cst_22 {dimension_numbers = #tpu.dot_dimension_numbers<[2], [1], [1], [2], [0, 0, 0, 1, 1, 2], [0], [0]>} : vector<2x16x16xf32>, vector<2x16x2xf32>, vector<2x16x2xf32> -> vector<2x16x2xf32>
    "tpu.trace_stop"() : () -> ()
    %83 = vector.extract_strided_slice %4 {offsets = [12, 0], sizes = [1, 8], strides = [1, 1]} : vector<13x8xf32> to vector<1x8xf32>
    %84 = vector.shape_cast %83 : vector<1x8xf32> to vector<1x1x8xf32>
    %85 = vector.shape_cast %84 : vector<1x1x8xf32> to vector<1x1x8xf32>
    %86 = vector.broadcast %85 : vector<1x1x8xf32> to vector<2x16x8xf32>
    %87 = vector.extract_strided_slice %4 {offsets = [0, 0], sizes = [4, 8], strides = [1, 1]} : vector<13x8xf32> to vector<4x8xf32>
    %88 = vector.shape_cast %87 : vector<4x8xf32> to vector<1x4x8xf32>
    %89 = vector.shape_cast %88 : vector<1x4x8xf32> to vector<1x4x8xf32>
    %90 = vector.broadcast %89 : vector<1x4x8xf32> to vector<2x4x8xf32>
    "tpu.trace_start"() <{level = 10 : i32, message = "bnc,bcp->bnp"}> : () -> ()
    %cst_23 = arith.constant dense<0.000000e+00> : vector<2x16x8xf32>
    %91 = tpu.matmul %0, %90, %cst_23 {dimension_numbers = #tpu.dot_dimension_numbers<[2], [1], [1], [2], [0, 0, 0, 1, 1, 2], [0], [0]>} : vector<2x16x4xf32>, vector<2x4x8xf32>, vector<2x16x8xf32> -> vector<2x16x8xf32>
    "tpu.trace_stop"() : () -> ()
    %92 = arith.addf %86, %91 : vector<2x16x8xf32>
    %93 = vector.extract_strided_slice %4 {offsets = [4, 0], sizes = [2, 8], strides = [1, 1]} : vector<13x8xf32> to vector<2x8xf32>
    %94 = vector.shape_cast %93 : vector<2x8xf32> to vector<1x2x8xf32>
    %95 = vector.shape_cast %94 : vector<1x2x8xf32> to vector<1x2x8xf32>
    %96 = vector.broadcast %95 : vector<1x2x8xf32> to vector<2x2x8xf32>
    "tpu.trace_start"() <{level = 10 : i32, message = "bnc,bcp->bnp"}> : () -> ()
    %cst_24 = arith.constant dense<0.000000e+00> : vector<2x16x8xf32>
    %97 = tpu.matmul %81, %96, %cst_24 {dimension_numbers = #tpu.dot_dimension_numbers<[2], [1], [1], [2], [0, 0, 0, 1, 1, 2], [0], [0]>} : vector<2x16x2xf32>, vector<2x2x8xf32>, vector<2x16x8xf32> -> vector<2x16x8xf32>
    "tpu.trace_stop"() : () -> ()
    %98 = arith.addf %92, %97 : vector<2x16x8xf32>
    %99 = vector.extract_strided_slice %4 {offsets = [6, 0], sizes = [4, 8], strides = [1, 1]} : vector<13x8xf32> to vector<4x8xf32>
    %100 = vector.shape_cast %99 : vector<4x8xf32> to vector<1x4x8xf32>
    %101 = vector.shape_cast %100 : vector<1x4x8xf32> to vector<1x4x8xf32>
    %102 = vector.broadcast %101 : vector<1x4x8xf32> to vector<2x4x8xf32>
    "tpu.trace_start"() <{level = 10 : i32, message = "bnc,bcp->bnp"}> : () -> ()
    %cst_25 = arith.constant dense<0.000000e+00> : vector<2x16x8xf32>
    %103 = tpu.matmul %23, %102, %cst_25 {dimension_numbers = #tpu.dot_dimension_numbers<[2], [1], [1], [2], [0, 0, 0, 1, 1, 2], [0], [0]>} : vector<2x16x4xf32>, vector<2x4x8xf32>, vector<2x16x8xf32> -> vector<2x16x8xf32>
    "tpu.trace_stop"() : () -> ()
    %104 = arith.addf %98, %103 : vector<2x16x8xf32>
    %105 = vector.extract_strided_slice %4 {offsets = [10, 0], sizes = [2, 8], strides = [1, 1]} : vector<13x8xf32> to vector<2x8xf32>
    %106 = vector.shape_cast %105 : vector<2x8xf32> to vector<1x2x8xf32>
    %107 = vector.shape_cast %106 : vector<1x2x8xf32> to vector<1x2x8xf32>
    %108 = vector.broadcast %107 : vector<1x2x8xf32> to vector<2x2x8xf32>
    "tpu.trace_start"() <{level = 10 : i32, message = "bnc,bcp->bnp"}> : () -> ()
    %cst_26 = arith.constant dense<0.000000e+00> : vector<2x16x8xf32>
    %109 = tpu.matmul %82, %108, %cst_26 {dimension_numbers = #tpu.dot_dimension_numbers<[2], [1], [1], [2], [0, 0, 0, 1, 1, 2], [0], [0]>} : vector<2x16x2xf32>, vector<2x2x8xf32>, vector<2x16x8xf32> -> vector<2x16x8xf32>
    "tpu.trace_stop"() : () -> ()
    %110 = arith.addf %104, %109 : vector<2x16x8xf32>
    %cst_27 = arith.constant 0.000000e+00 : f32
    %111 = vector.broadcast %cst_27 : f32 to vector<2x16x2xf32>
    %112 = vector.extract_strided_slice %22 {offsets = [0, 0, 0], sizes = [2, 16, 1], strides = [1, 1, 1]} : vector<2x16x4xf32> to vector<2x16x1xf32>
    %113 = vector.extract_strided_slice %110 {offsets = [0, 0, 0], sizes = [2, 16, 2], strides = [1, 1, 1]} : vector<2x16x8xf32> to vector<2x16x2xf32>
    %114 = vector.broadcast %112 : vector<2x16x1xf32> to vector<2x16x2xf32>
    %115 = arith.mulf %114, %113 : vector<2x16x2xf32>
    %116 = arith.addf %111, %115 : vector<2x16x2xf32>
    %117 = vector.extract_strided_slice %22 {offsets = [0, 0, 1], sizes = [2, 16, 1], strides = [1, 1, 1]} : vector<2x16x4xf32> to vector<2x16x1xf32>
    %118 = vector.extract_strided_slice %110 {offsets = [0, 0, 2], sizes = [2, 16, 2], strides = [1, 1, 1]} : vector<2x16x8xf32> to vector<2x16x2xf32>
    %119 = vector.broadcast %117 : vector<2x16x1xf32> to vector<2x16x2xf32>
    %120 = arith.mulf %119, %118 : vector<2x16x2xf32>
    %121 = arith.addf %116, %120 : vector<2x16x2xf32>
    %122 = vector.extract_strided_slice %22 {offsets = [0, 0, 2], sizes = [2, 16, 1], strides = [1, 1, 1]} : vector<2x16x4xf32> to vector<2x16x1xf32>
    %123 = vector.extract_strided_slice %110 {offsets = [0, 0, 4], sizes = [2, 16, 2], strides = [1, 1, 1]} : vector<2x16x8xf32> to vector<2x16x2xf32>
    %124 = vector.broadcast %122 : vector<2x16x1xf32> to vector<2x16x2xf32>
    %125 = arith.mulf %124, %123 : vector<2x16x2xf32>
    %126 = arith.addf %121, %125 : vector<2x16x2xf32>
    %127 = vector.extract_strided_slice %22 {offsets = [0, 0, 3], sizes = [2, 16, 1], strides = [1, 1, 1]} : vector<2x16x4xf32> to vector<2x16x1xf32>
    %128 = vector.extract_strided_slice %110 {offsets = [0, 0, 6], sizes = [2, 16, 2], strides = [1, 1, 1]} : vector<2x16x8xf32> to vector<2x16x2xf32>
    %129 = vector.broadcast %127 : vector<2x16x1xf32> to vector<2x16x2xf32>
    %130 = arith.mulf %129, %128 : vector<2x16x2xf32>
    %131 = arith.addf %126, %130 : vector<2x16x2xf32>
    %132 = math.tanh %131 : vector<2x16x2xf32>
    %133 = arith.mulf %80, %1 : vector<2x16x2xf32>
    %cst_28 = arith.constant 1.000000e+00 : f32
    %134 = vector.broadcast %cst_28 : f32 to vector<2x16x2xf32>
    %135 = arith.subf %134, %80 : vector<2x16x2xf32>
    %136 = arith.mulf %135, %132 : vector<2x16x2xf32>
    %137 = arith.addf %133, %136 : vector<2x16x2xf32>
    %cst_29 = arith.constant 0.000000e+00 : f32
    %138 = vector.broadcast %cst_29 : f32 to vector<2x16x2xf32>
    %139 = arith.maximumf %137, %138 : vector<2x16x2xf32>
    %cst_30 = arith.constant 0.000000e+00 : f32
    %140 = vector.broadcast %cst_30 : f32 to vector<2x16x1xf32>
    %c0_31 = arith.constant 0 : index
    %c0_32 = arith.constant 0 : index
    %141 = memref.load %arg6[%c0_31, %c0_32] : memref<1x1xf32, #tpu.memory_space<smem>>
    %142 = vector.broadcast %141 : f32 to vector<2x16x1xf32>
    %143 = arith.addf %140, %142 : vector<2x16x1xf32>
    %144 = vector.extract_strided_slice %139 {offsets = [0, 0, 0], sizes = [2, 16, 1], strides = [1, 1, 1]} : vector<2x16x2xf32> to vector<2x16x1xf32>
    %c0_33 = arith.constant 0 : index
    %c0_34 = arith.constant 0 : index
    %145 = memref.load %arg5[%c0_33, %c0_34] : memref<1x2xf32, #tpu.memory_space<smem>>
    %146 = vector.broadcast %145 : f32 to vector<2x16x1xf32>
    %147 = arith.mulf %144, %146 : vector<2x16x1xf32>
    %148 = arith.addf %143, %147 : vector<2x16x1xf32>
    %149 = vector.extract_strided_slice %139 {offsets = [0, 0, 1], sizes = [2, 16, 1], strides = [1, 1, 1]} : vector<2x16x2xf32> to vector<2x16x1xf32>
    %c0_35 = arith.constant 0 : index
    %c1 = arith.constant 1 : index
    %150 = memref.load %arg5[%c0_35, %c1] : memref<1x2xf32, #tpu.memory_space<smem>>
    %151 = vector.broadcast %150 : f32 to vector<2x16x1xf32>
    %152 = arith.mulf %149, %151 : vector<2x16x1xf32>
    %153 = arith.addf %148, %152 : vector<2x16x1xf32>
    %c0_36 = arith.constant 0 : index
    %c0_37 = arith.constant 0 : index
    %c0_38 = arith.constant 0 : index
    %154 = vector.load %arg7[%c0_36, %c0_37, %c0_38] : memref<2x16x3xf32, #tpu.memory_space<vmem>>, vector<2x16x2xf32>
    tpu.vector_store %arg7[%c0_36, %c0_37, %c0_38], %137 {strides = array<i32>} : memref<2x16x3xf32, #tpu.memory_space<vmem>>, vector<2x16x2xf32>,
    %c0_39 = arith.constant 0 : index
    %c0_40 = arith.constant 0 : index
    %c2 = arith.constant 2 : index
    %155 = vector.load %arg7[%c0_39, %c0_40, %c2] : memref<2x16x3xf32, #tpu.memory_space<vmem>>, vector<2x16x1xf32>
    tpu.vector_store %arg7[%c0_39, %c0_40, %c2], %153 {strides = array<i32>} : memref<2x16x3xf32, #tpu.memory_space<vmem>>, vector<2x16x1xf32>,
    return
  }
}

</mosaic_0001>

<bundles_post_ra>
// kernel: tpu_custom_call.1
= control target key start
LH: loop header
LB: loop body
LE: loop exit
PB: predicated region body
PF: predicated region fallthrough
CT: control target
= control target key end

     0   :  { %13 = vsyncpa [#allocation4], 0  ;;  %s3117_s0 = inlined_call_operand.vmem [shape: f32[2,16,4], index: 0, kind: input, shape index: {}]   ;;  %s3118_s1 = inlined_call_operand.vmem [shape: f32[2,16,2], index: 1, kind: input, shape index: {}]   ;;  %s3119_s2 = inlined_call_operand.vmem [shape: f32[16,4], index: 2, kind: input, shape index: {}]   ;;  %s3120_s3 = inlined_call_operand.vmem [shape: f32[13,16], index: 3, kind: input, shape index: {}]   ;;  %s3121_s4 = inlined_call_operand.vmem [shape: f32[13,8], index: 4, kind: input, shape index: {}]   ;;  %s3122_s5 = inlined_call_operand.vmem [shape: f32[1,2], index: 5, kind: input, shape index: {}]   ;;  %s3123_s6 = inlined_call_operand.<no memory space> [shape: f32[1,1], index: 6, kind: input, shape index: {}]   ;;  %s3124_s7 = inlined_call_operand.vmem [shape: f32[2,16,3], index: 7, kind: output, shape index: {}]  }
   0x1   :  { %s30_s26 = sshll.u32 %s3122_s5, 4  ;;  %s31_s26 = int_to_ptr.vmem [resolvable:$true] %s30_s26 }
   0x2   :  { %s2689_s27 = scalar_lea.vmem %s31_s26, 16  ;;  %p2694_p1 = scmp.lt.s32.totalorder %s31_s26, %s31_s26 }
   0x3   :  { %p2690_p0 = scmp.ne.s32.totalorder %s31_s26, %s2689_s27  ;;  %p2695_p2 = scmp.lt.s32.totalorder %s2689_s27, %s2689_s27 }
   0x5   :  { %p2696_p3 = por %p2695_p2, %p2694_p1 }
   0x7   :  { %p2697_p4 = pnand %p2696_p3, %p2690_p0 }
   0x9   :  { %2700 = shalt.err (!%p2697_p4)
}
   0xa   :  { %s2703_s28 = smov [#allocation3]  }
   0xb   :  { %33 = dma.vmem_to_smem %s31_s26, 16, %s2703_s28, [#allocation4]  }
   0xc   :  { %2701 = dma.done.wait [#allocation4], 16  }
   0xd   :  { %2702 = vsyncadd [#allocation4], 4294967280 }
   0xe   :  { %39 = sfence }
   0xf   :  { %v2761_v0 = vld [vmem:[%s3119_s2] sm:$0xff]  ;;  %v2766_v1 = vld [vmem:[%s3119_s2 + $0x8] sm:$0xff]  ;;  %vm54_vm0 = vcmask 31744   ;;  %vm138_vm2 = vcmask 130048   ;;  %v2807_v25 = vld [vmem:[%s3117_s0 + $0x10] sm:$0xff]  ;;  %vm477_vm3 = vcmask 1043456   ;;  %v467_v56 = vlaneseq }
  0x10   :  { %v2577_v2 = vpack.c.bf16 %v2766_v1, %v2761_v0  ;;  %vm2578_vm1 = vmpackc.low %vm54_vm0, %vm54_vm0  ;;  %2452 = vmatprep.mubr.msk.f32.mxu0 %vm54_vm0, %v2761_v0  ;;  %v2783_v19 = vld [vmem:[%s3117_s0] sm:$0xff]  ;;  %v2788_v20 = vld [vmem:[%s3117_s0 + $0x8] sm:$0xff]  ;;  %vm649_vm4 = vcmask 1041408   ;;  %vm642_vm5 = vcmask 15360   ;;  %v2704_v44 = vmov 1   ;;  %s2710_s27 = smov 116  }
  0x11   :  { %v2793_v21 = vld [vmem:[%s3118_s1] sm:$0xff]  ;;  %v2583_v22 = vpack.c.bf16 %v2788_v20, %v2783_v19  ;;  %v2800_v23 = vld [vmem:[%s3118_s1 + $0x8] sm:$0xff]  ;;  %v2812_v26 = vld [vmem:[%s3117_s0 + $0x18] sm:$0xff]  ;;  %2652 = vset.pattern.permute.xlu1 %v2704_v44  ;;  %2651 = vset.pattern.permute.xlu0 %v2704_v44  ;;  %v2705_v45 = vmov 2   ;;  %v2706_v46 = vmov 3   ;;  %v2707_v47 = vmov 0  }
  0x12   :  { %2579 = vmatprep.subr.msk.bf16.mxu0 %vm2578_vm1, %v2577_v2  ;;  %v2591_v24 = vpack.c.bf16 %v2800_v23, %v2793_v21  ;;  %v2587_v27 = vpack.c.bf16 %v2812_v26, %v2807_v25  ;;  %v50_v28 = vld [vmem:[%s3120_s3] sm:$0xff]  ;;  %v2825_v33 = vld [vmem:[%s3118_s1 + $0x10] sm:$0xff]  ;;  %v2830_v34 = vld [vmem:[%s3118_s1 + $0x18] sm:$0xff]  ;;  %v2925_v58 = vshrl.u32 %v467_v56, 7  ;;  %s2708_s1 = smov 124   ;;  %s2712_s5 = smov 122  }
  0x13   :  { %2582 = vmatpush3.bf16.xpose.msk.msra.mxu0 %vm2578_vm1, %v2577_v2  ;;  %2584 = vmatprep.subr.bf16.mxu1 %v2583_v22  ;;  %v2839_v36 = vld [vmem:[%s3120_s3 + $0x8] sm:$0x1f]  ;;  %v2595_v38 = vpack.c.bf16 %v2830_v34, %v2825_v33  ;;  %v641_v39 = vrot.slane %v50_v28, 4  ;;  %v813_v40 = vrot.slane %v50_v28, 6  ;;  %s2709_s3 = smov 120   ;;  %s2713_s2 = smov 2  }
  0x14   :  { %2592 = vmatprep.subr.bf16.mxu0 %v2591_v24  ;;  %2586 = vmatpush3.bf16.msra.mxu1 %v2583_v22  ;;  %v814_v41 = vrot.slane %v2839_v36, 6  ;;  %v984_v43 = vrot.slane %v2839_v36, 2  ;;  %v469_v60 = vsub.s32 4, %v2925_v58  ;;  %s2371_s9 = sld [smem:[#allocation3 + $0x1]]  ;;  %s2714_s10 = smov 127   ;;  %vm2293_vm6 = vcmask 23568  }
  0x15   :  { %2588 = vmatprep.subr.bf16.mxu1 %v2587_v27  ;;  %s2237_s11 = sld [smem:[#allocation3]] }
  0x16   :  { %v815_v42 = vsel %vm649_vm4, %v813_v40, %v814_v41  ;;  %v470_v61 = vrot.slane %v2839_v36, %v469_v60 }
  0x1a   :  { %2453 = vmatmul.mubr.msk.f32.vlgmr.msra.gmra.mrb[0].mxu0 %vm54_vm0, %v2766_v1 }
  0x1b   :  { %2594 = vmatpush3.bf16.msra.mxu0 %v2591_v24 }
  0x1c   :  { %2483 = vmatprep.subr.msk.mxu0 %vm477_vm3, %v50_v28 }
  0xed   :  { %v2454_v3 = vpop.f32.mrb[0].mxu0 }
  0xee   :  { %v127_v4 = vpop.f32.mrb[1].mxu0  ;;  %v137_v6 = vmax.f32 %v2454_v3, 0.0 }
  0xef   :  { %v136_v5 = vmax.f32 %v127_v4, 0.0 }
  0xf0   :  { %v142_v8 = vsel %vm138_vm2, %v137_v6, -inf }
  0xf1   :  { %v139_v7 = vsel %vm138_vm2, %v136_v5, -inf }
  0xf2   :  { %140 = vmax.xlane.f32.xlu0 %v139_v7 }
  0xf6   :  { %143 = vmax.xlane.f32.xlu0 %v142_v8 }
 0x10c   :  { %1170 = vperm.xlu0 %2651, %v2761_v0  }
 0x110   :  { %2656 = vset.pattern.permute.xlu0 %v2706_v46 }
 0x17f   :  { %v141_v9 = vpop.xlane.xlu0 %140 }
 0x180   :  { %v145_v10 = vsub.f32 %v136_v5, %v141_v9 }
 0x182   :  { %v147_v11 = vmul.f32 1.442695, %v145_v10 }
 0x183   :  { %v144_v12 = vpop.xlane.xlu0 %143 }
 0x184   :  { %2657 = vpow2.f32 %v147_v11  ;;  %v146_v13 = vsub.f32 %v137_v6, %v144_v12 }
 0x186   :  { %v149_v14 = vmul.f32 1.442695, %v146_v13 }
 0x188   :  { %2659 = vpow2.f32 %v149_v14 }
 0x18b   :  { %v2935_v2 = vpop.permute.xlu0 %1170 }
 0x18e   :  { %v2658_v15 = vpop.eup %2657 }
 0x18f   :  { %v151_v16 = vsel %vm138_vm2, %v2658_v15, 0.0 }
 0x190   :  { %152 = vadd.xlane.f32.xlu1 %v151_v16 }
 0x192   :  { %v2660_v17 = vpop.eup %2659 }
 0x193   :  { %v154_v18 = vsel %vm138_vm2, %v2660_v17, 0.0 }
 0x194   :  { %155 = vadd.xlane.f32.xlu1 %v154_v18 }
 0x1a5   :  { %1174 = vperm.xlu1 %2652, %v2766_v1  }
 0x1a9   :  { %2653 = vset.pattern.permute.xlu1 %v2705_v45 }
 0x1aa   :  { %1202 = vperm.xlu1 %2653, %v2761_v0  }
 0x1ae   :  { %1206 = vperm.xlu1 %2653, %v2766_v1  }
 0x1b2   :  { %2654 = vset.pattern.permute.xlu1 %v2706_v46 }
 0x1b3   :  { %1234 = vperm.xlu1 %2654, %v2761_v0  }
 0x1b7   :  { %1238 = vperm.xlu1 %2654, %v2766_v1  }
 0x1bb   :  { %2655 = vset.pattern.permute.xlu1 %v2707_v47 }
 0x1bc   :  { %1154 = vperm.xlu1 %2655, %v2761_v0  }
 0x1c0   :  { %1158 = vperm.xlu1 %2655, %v2766_v1  }
 0x21d   :  { %v153_v29 = vpop.xlane.xlu1 %152 }
 0x21e   :  { %2661 = vrcp.f32 %v153_v29 }
 0x221   :  { %v156_v30 = vpop.xlane.xlu1 %155 }
 0x222   :  { %2663 = vrcp.f32 %v156_v30 }
 0x225   :  { %v2923_v57 = vpop.permute.xlu1 %1174 }
 0x228   :  { %v2662_v31 = vpop.eup %2661 }
 0x229   :  { %v2820_v32 = vmul.f32 %v2662_v31, %v2658_v15  ;;  %v2927_v59 = vpop.permute.xlu1 %1202 }
 0x22b   :  { %2459 = vmatprep.mubr.msk.f32.mxu1 %vm138_vm2, %v2820_v32  ;;  %2473 = vmatprep.mubr.msk.f32.mxu0 %vm138_vm2, %v2820_v32 }
 0x22c   :  { %v2664_v35 = vpop.eup %2663 }
 0x22d   :  { %v2841_v37 = vmul.f32 %v2664_v35, %v2660_v17  ;;  %v2933_v62 = vpop.permute.xlu1 %1206 }
 0x22f   :  { %2460 = vmatmul.mubr.msk.f32.vlgmr.msra.gmra.mrb[0].mxu1 %vm138_vm2, %v2841_v37  ;;  %2474 = vmatmul.mubr.msk.f32.vlgmr.msra.gmra.mrb[2].mxu0 %vm138_vm2, %v2841_v37 }
 0x230   :  { %2590 = vmatpush3.bf16.msra.mxu1 %v2587_v27  ;;  %2466 = vmatprep.mubr.msk.f32.mxu1 %vm138_vm2, %v2820_v32 }
 0x231   :  { %2596 = vmatprep.subr.bf16.mxu1 %v2595_v38  ;;  %2484 = vmatpush3.msk.msra.mxu0 %vm477_vm3, %v50_v28 }
 0x232   :  { %2485 = vmatprep.mubr.msk.f32.mxu0 %vm54_vm0, %v2783_v19  ;;  %2493 = vmatprep.subr.msk.mxu0 %vm649_vm4, %v641_v39  ;;  %v2938_v5 = vpop.permute.xlu1 %1234 }
 0x233   :  { %2467 = vmatmul.mubr.msk.f32.vlgmr.msra.gmra.mrb[2].mxu1 %vm138_vm2, %v2841_v37  ;;  %2486 = vmatmul.mubr.msk.f32.vlgmr.msra.gmra.mrb[4].mxu0 %vm54_vm0, %v2788_v20 }
 0x234   :  { %2598 = vmatpush3.bf16.msra.mxu1 %v2595_v38  ;;  %2480 = vmatprep.mubr.msk.f32.mxu1 %vm138_vm2, %v2820_v32 }
 0x235   :  { %2494 = vmatpush3.msk.msra.mxu0 %vm649_vm4, %v641_v39  ;;  %2488 = vmatprep.subr.msk.mxu1 %vm477_vm3, %v50_v28 }
 0x236   :  { %2495 = vmatprep.mubr.msk.f32.mxu0 %vm642_vm5, %v2793_v21  ;;  %2503 = vmatprep.subr.msk.mxu0 %vm477_vm3, %v815_v42  ;;  %v2945_v11 = vpop.permute.xlu1 %1238 }
 0x237   :  { %2481 = vmatmul.mubr.msk.f32.vlgmr.msra.gmra.mrb[4].mxu1 %vm138_vm2, %v2841_v37 }
 0x238   :  { %2489 = vmatpush3.msk.msra.mxu1 %vm477_vm3, %v50_v28  ;;  %2490 = vmatprep.mubr.msk.f32.mxu1 %vm54_vm0, %v2807_v25 }
 0x239   :  { %2498 = vmatprep.subr.msk.mxu1 %vm649_vm4, %v641_v39 }
 0x23b   :  { %2491 = vmatmul.mubr.msk.f32.vlgmr.msra.gmra.mrb[6].mxu1 %vm54_vm0, %v2812_v26  ;;  %2496 = vmatmul.mubr.msk.f32.vlgmr.msra.gmra.mrb[4].mxu0 %vm642_vm5, %v2800_v23  ;;  %v2957_v28 = vpop.permute.xlu1 %1154 }
 0x23c   :  { %2504 = vmatpush3.msk.msra.mxu0 %vm477_vm3, %v815_v42  ;;  %2499 = vmatpush3.msk.msra.mxu1 %vm649_vm4, %v641_v39 }
 0x23d   :  { %2500 = vmatprep.mubr.msk.f32.mxu1 %vm642_vm5, %v2825_v33  ;;  %2508 = vmatprep.subr.msk.mxu1 %vm477_vm3, %v815_v42 }
 0x23e   :  { %2513 = vmatprep.subr.msk.mxu0 %vm649_vm4, %v984_v43 }
 0x23f   :  { %v2959_v29 = vpop.permute.xlu1 %1158 }
 0x243   :  { %2501 = vmatmul.mubr.msk.f32.vlgmr.msra.gmra.mrb[6].mxu1 %vm642_vm5, %v2830_v34 }
 0x244   :  { %2509 = vmatpush3.msk.msra.mxu1 %vm477_vm3, %v815_v42 }
 0x245   :  { %2518 = vmatprep.subr.msk.mxu1 %vm649_vm4, %v984_v43 }
 0x302   :  { %v2897_v48 = vpop.f32.mrb[0].mxu1  ;;  %v2475_v49 = vpop.f32.mrb[2].mxu0 }
 0x303   :  { %v2899_v50 = vpop.f32.mrb[1].mxu1  ;;  %v383_v51 = vpop.f32.mrb[3].mxu0 }
 0x304   :  { %2505 = vmatprep.mubr.msk.f32.mxu0 %vm54_vm0, %v2899_v50 }
 0x305   :  { %2506 = vmatmul.mubr.msk.f32.vlgmr.msra.gmra.mrb[4].mxu0 %vm54_vm0, %v2897_v48 }
 0x306   :  { %v2905_v52 = vpop.f32.mrb[2].mxu1  ;;  %2514 = vmatpush3.msk.msra.mxu0 %vm649_vm4, %v984_v43  ;;  %2515 = vmatprep.mubr.msk.f32.mxu0 %vm642_vm5, %v383_v51 }
 0x307   :  { %v2909_v53 = vpop.f32.mrb[3].mxu1 }
 0x308   :  { %2510 = vmatprep.mubr.msk.f32.mxu1 %vm54_vm0, %v2909_v53 }
 0x309   :  { %2511 = vmatmul.mubr.msk.f32.vlgmr.msra.gmra.mrb[6].mxu1 %vm54_vm0, %v2905_v52 }
 0x30a   :  { %v2482_v54 = vpop.f32.mrb[4].mxu1  ;;  %2519 = vmatpush3.msk.msra.mxu1 %vm649_vm4, %v984_v43 }
 0x30b   :  { %v458_v55 = vpop.f32.mrb[5].mxu1 }
 0x30c   :  { %2520 = vmatprep.mubr.msk.f32.mxu1 %vm642_vm5, %v458_v55 }
 0x30d   :  { %2516 = vmatmul.mubr.msk.f32.vlgmr.msra.gmra.mrb[4].mxu0 %vm642_vm5, %v2475_v49 }
 0x30e   :  { %2527 = vmatprep.mubr.msk.f32.mxu0 %vm138_vm2, %v2820_v32 }
 0x311   :  { %2521 = vmatmul.mubr.msk.f32.vlgmr.msra.gmra.mrb[6].mxu1 %vm642_vm5, %v2482_v54 }
 0x312   :  { %2534 = vmatprep.mubr.msk.f32.mxu1 %vm138_vm2, %v2820_v32 }
 0x3e0   :  { %v2517_v63 = vpop.f32.mrb[4].mxu0 }
 0x3e1   :  { %v2607_v0 = vadd.f32 %v2517_v63, %v470_v61  ;;  %v1059_v1 = vpop.f32.mrb[5].mxu0 }
 0x3e2   :  { %v2608_v3 = vadd.f32 %v1059_v1, %v470_v61 }
 0x3e3   :  { %v1178_v4 = vmul.f32 %v2607_v0, %v2923_v57  ;;  %v1210_v9 = vmul.f32 %v2607_v0, %v2933_v62  ;;  %v1242_v13 = vmul.f32 %v2607_v0, %v2945_v11  ;;  %v1162_v32 = vmul.f32 %v2607_v0, %v2959_v29 }
 0x3e4   :  { %v2522_v6 = vpop.f32.mrb[6].mxu1  ;;  %v1177_v7 = vmul.f32 %v2608_v3, %v2935_v2  ;;  %v1209_v10 = vmul.f32 %v2608_v3, %v2927_v59  ;;  %v1241_v15 = vmul.f32 %v2608_v3, %v2938_v5  ;;  %v1161_v35 = vmul.f32 %v2608_v3, %v2957_v28 }
 0x3e5   :  { %1187 = vrot.lane.b32.xlu0 %v1178_v4, %s2708_s1  ;;  %v1140_v8 = vpop.f32.mrb[7].mxu1  ;;  %v2609_v12 = vadd.f32 %v2522_v6, %v470_v61 }
 0x3e6   :  { %1185 = vrot.lane.b32.xlu1 %v1177_v7, %s2708_s1  ;;  %v2610_v14 = vadd.f32 %v1140_v8, %v470_v61 }
 0x3e7   :  { %v1180_v16 = vmul.f32 %v2609_v12, %v2923_v57  ;;  %v1212_v18 = vmul.f32 %v2609_v12, %v2933_v62  ;;  %v1244_v24 = vmul.f32 %v2609_v12, %v2945_v11  ;;  %v1164_v55 = vmul.f32 %v2609_v12, %v2959_v29 }
 0x3e8   :  { %v1179_v17 = vmul.f32 %v2610_v14, %v2935_v2  ;;  %v1211_v22 = vmul.f32 %v2610_v14, %v2927_v59  ;;  %v1243_v27 = vmul.f32 %v2610_v14, %v2938_v5  ;;  %v1163_v56 = vmul.f32 %v2610_v14, %v2957_v28 }
 0x3e9   :  { %1219 = vrot.lane.b32.xlu0 %v1210_v9, %s2709_s3 }
 0x3ea   :  { %1217 = vrot.lane.b32.xlu1 %v1209_v10, %s2709_s3 }
 0x3ed   :  { %1251 = vrot.lane.b32.xlu0 %v1242_v13, %s2710_s27 }
 0x3ee   :  { %1249 = vrot.lane.b32.xlu1 %v1241_v15, %s2710_s27 }
 0x3f1   :  { %1191 = vrot.lane.b32.xlu0 %v1180_v16, %s2708_s1 }
 0x3f2   :  { %1189 = vrot.lane.b32.xlu1 %v1179_v17, %s2708_s1 }
 0x3f5   :  { %1223 = vrot.lane.b32.xlu0 %v1212_v18, %s2709_s3 }
 0x3f6   :  { %1221 = vrot.lane.b32.xlu1 %v1211_v22, %s2709_s3 }
 0x3f9   :  { %1255 = vrot.lane.b32.xlu0 %v1244_v24, %s2710_s27 }
 0x3fa   :  { %1253 = vrot.lane.b32.xlu1 %v1243_v27, %s2710_s27 }
 0x457   :  { %v1188_v30 = vpop.permute.xlu0 %1187 }
 0x458   :  { %v1186_v31 = vpop.permute.xlu1 %1185  ;;  %v1198_v38 = vadd.f32 %v1188_v30, %v1162_v32 }
 0x459   :  { %v1197_v40 = vadd.f32 %v1186_v31, %v1161_v35 }
 0x45b   :  { %v1220_v36 = vpop.permute.xlu0 %1219 }
 0x45c   :  { %v1218_v39 = vpop.permute.xlu1 %1217  ;;  %v1230_v41 = vadd.f32 %v1220_v36, %v1198_v38  ;;  %v52_v36 = vld [vmem:[%s3121_s4] sm:$0xff]  ;;  %v53_v38 = vld [vmem:[%s3121_s4 + $0x8] sm:$0x1f]  ;;  %s2711_s4 = smov 126  }
 0x45d   :  { %v1229_v42 = vadd.f32 %v1218_v39, %v1197_v40  ;;  %v1604_v39 = vrot.slane %v52_v36, 4  ;;  %v1774_v40 = vrot.slane %v52_v36, 6 }
 0x45f   :  { %v1252_v43 = vpop.permute.xlu0 %1251 }
 0x460   :  { %v1262_v44 = vadd.f32 %v1252_v43, %v1230_v41  ;;  %v1250_v45 = vpop.permute.xlu1 %1249  ;;  %v1775_v41 = vrot.slane %v53_v38, 6 }
 0x461   :  { %v1261_v46 = vadd.f32 %v1250_v45, %v1229_v42 }
 0x462   :  { %v2340_v47 = vmul.f32 -1.442695, %v1262_v44  ;;  %v1776_v43 = vsel %vm649_vm4, %v1774_v40, %v1775_v41 }
 0x463   :  { %v2339_v49 = vmul.f32 -1.442695, %v1261_v46  ;;  %v1192_v51 = vpop.permute.xlu0 %1191 }
 0x464   :  { %2665 = vpow2.f32 %v2340_v47  ;;  %v1190_v54 = vpop.permute.xlu1 %1189  ;;  %v1200_v63 = vadd.f32 %v1192_v51, %v1164_v55  ;;  %v1933_v47 = vrot.slane %v53_v38, 2 }
 0x465   :  { %2667 = vpow2.f32 %v2339_v49  ;;  %v1199_v1 = vadd.f32 %v1190_v54, %v1163_v56 }
 0x467   :  { %v1224_v61 = vpop.permute.xlu0 %1223 }
 0x468   :  { %v1222_v0 = vpop.permute.xlu1 %1221  ;;  %v1232_v3 = vadd.f32 %v1224_v61, %v1200_v63 }
 0x469   :  { %v1231_v4 = vadd.f32 %v1222_v0, %v1199_v1 }
 0x46b   :  { %v1256_v6 = vpop.permute.xlu0 %1255 }
 0x46c   :  { %v1264_v7 = vadd.f32 %v1256_v6, %v1232_v3  ;;  %v1254_v8 = vpop.permute.xlu1 %1253 }
 0x46d   :  { %v1263_v9 = vadd.f32 %v1254_v8, %v1231_v4 }
 0x46e   :  { %v2666_v10 = vpop.eup %2665  ;;  %v2342_v13 = vmul.f32 -1.442695, %v1264_v7 }
 0x46f   :  { %v2668_v15 = vpop.eup %2667  ;;  %v1278_v16 = vadd.f32 1.0, %v2666_v10  ;;  %v2341_v17 = vmul.f32 -1.442695, %v1263_v9 }
 0x470   :  { %v1277_v18 = vadd.f32 1.0, %v2668_v15  ;;  %2669 = vpow2.f32 %v2342_v13 }
 0x471   :  { %2671 = vrcp.f32 %v1278_v16 }
 0x472   :  { %2673 = vrcp.f32 %v1277_v18 }
 0x473   :  { %2675 = vpow2.f32 %v2341_v17 }
 0x47a   :  { %v2670_v12 = vpop.eup %2669 }
 0x47b   :  { %v2965_v14 = vpop.eup %2671  ;;  %v1280_v22 = vadd.f32 1.0, %v2670_v12 }
 0x47c   :  { %v2967_v24 = vpop.eup %2673  ;;  %v1290_v27 = vmul.f32 %v2965_v14, %v2800_v23 }
 0x47d   :  { %v2676_v30 = vpop.eup %2675  ;;  %2677 = vrcp.f32 %v1280_v22  ;;  %v1289_v31 = vmul.f32 %v2967_v24, %v2793_v21 }
 0x47e   :  { %v1279_v32 = vadd.f32 1.0, %v2676_v30 }
 0x47f   :  { %v2599_v35 = vpack.c.bf16 %v1290_v27, %v1289_v31 }
 0x480   :  { %2679 = vrcp.f32 %v1279_v32 }
 0x481   :  { %2600 = vmatprep.subr.bf16.mxu0 %v2599_v35 }
 0x482   :  { %2602 = vmatpush3.bf16.msra.mxu0 %v2599_v35 }
 0x483   :  { %2537 = vmatprep.subr.msk.mxu0 %vm477_vm3, %v52_v36 }
 0x485   :  { %2528 = vmatmul.mubr.msk.f32.vlgmr.msra.gmra.mrb[6].mxu0 %vm138_vm2, %v2841_v37 }
 0x486   :  { %2538 = vmatpush3.msk.msra.mxu0 %vm477_vm3, %v52_v36  ;;  %2539 = vmatprep.mubr.msk.f32.mxu0 %vm54_vm0, %v2783_v19 }
 0x487   :  { %v2985_v42 = vpop.eup %2677  ;;  %2547 = vmatprep.subr.msk.mxu0 %vm649_vm4, %v1604_v39 }
 0x488   :  { %v1292_v44 = vmul.f32 %v2985_v42, %v2830_v34 }
 0x489   :  { %2540 = vmatmul.mubr.msk.f32.vlgmr.msra.gmra.mrb[8].mxu0 %vm54_vm0, %v2788_v20 }
 0x48a   :  { %v2993_v45 = vpop.eup %2679  ;;  %2549 = vmatprep.mubr.msk.f32.mxu0 %vm642_vm5, %v1289_v31  ;;  %2548 = vmatpush3.msk.msra.mxu0 %vm649_vm4, %v1604_v39 }
 0x48b   :  { %v1291_v19 = vmul.f32 %v2993_v45, %v2825_v33  ;;  %2557 = vmatprep.subr.msk.mxu0 %vm477_vm3, %v1776_v43 }
 0x48d   :  { %v2603_v46 = vpack.c.bf16 %v1292_v44, %v1291_v19 }
 0x48f   :  { %2604 = vmatprep.subr.bf16.mxu1 %v2603_v46 }
 0x490   :  { %2606 = vmatpush3.bf16.msra.mxu1 %v2603_v46 }
 0x491   :  { %2550 = vmatmul.mubr.msk.f32.vlgmr.msra.gmra.mrb[8].mxu0 %vm642_vm5, %v1290_v27  ;;  %2542 = vmatprep.subr.msk.mxu1 %vm477_vm3, %v52_v36 }
 0x492   :  { %2559 = vmatprep.mubr.msk.f32.mxu0 %vm54_vm0, %v2899_v50  ;;  %2558 = vmatpush3.msk.msra.mxu0 %vm477_vm3, %v1776_v43 }
 0x493   :  { %2535 = vmatmul.mubr.msk.f32.vlgmr.msra.gmra.mrb[8].mxu1 %vm138_vm2, %v2841_v37  ;;  %2567 = vmatprep.subr.msk.mxu0 %vm649_vm4, %v1933_v47 }
 0x494   :  { %2543 = vmatpush3.msk.msra.mxu1 %vm477_vm3, %v52_v36  ;;  %2544 = vmatprep.mubr.msk.f32.mxu1 %vm54_vm0, %v2807_v25 }
 0x495   :  { %2552 = vmatprep.subr.msk.mxu1 %vm649_vm4, %v1604_v39 }
 0x497   :  { %2545 = vmatmul.mubr.msk.f32.vlgmr.msra.gmra.mrb[10].mxu1 %vm54_vm0, %v2812_v26 }
 0x498   :  { %2554 = vmatprep.mubr.msk.f32.mxu1 %vm642_vm5, %v1291_v19  ;;  %2553 = vmatpush3.msk.msra.mxu1 %vm649_vm4, %v1604_v39 }
 0x499   :  { %2560 = vmatmul.mubr.msk.f32.vlgmr.msra.gmra.mrb[8].mxu0 %vm54_vm0, %v2897_v48  ;;  %2562 = vmatprep.subr.msk.mxu1 %vm477_vm3, %v1776_v43  ;;  %v1446_v48 = vrot.slane %v53_v38, %v469_v60 }
 0x49a   :  { %2568 = vmatpush3.msk.msra.mxu0 %vm649_vm4, %v1933_v47 }
 0x49f   :  { %2555 = vmatmul.mubr.msk.f32.vlgmr.msra.gmra.mrb[10].mxu1 %vm642_vm5, %v1292_v44 }
 0x4a0   :  { %2564 = vmatprep.mubr.msk.f32.mxu1 %vm54_vm0, %v2909_v53  ;;  %2563 = vmatpush3.msk.msra.mxu1 %vm477_vm3, %v1776_v43 }
 0x4a1   :  { %2572 = vmatprep.subr.msk.mxu1 %vm649_vm4, %v1933_v47 }
 0x4a7   :  { %2565 = vmatmul.mubr.msk.f32.vlgmr.msra.gmra.mrb[10].mxu1 %vm54_vm0, %v2905_v52 }
 0x4a8   :  { %2573 = vmatpush3.msk.msra.mxu1 %vm649_vm4, %v1933_v47 }
 0x558   :  { %v2529_v20 = vpop.f32.mrb[6].mxu0 }
 0x559   :  { %v1359_v25 = vpop.f32.mrb[7].mxu0 }
 0x55a   :  { %2569 = vmatprep.mubr.msk.f32.mxu0 %vm642_vm5, %v1359_v25  ;;  %v2203_v25 = vsub.f32 1.0, %v2965_v14 }
 0x55b   :  { %2570 = vmatmul.mubr.msk.f32.vlgmr.msra.gmra.mrb[8].mxu0 %vm642_vm5, %v2529_v20 }
 0x566   :  { %v2536_v26 = vpop.f32.mrb[8].mxu1 }
 0x567   :  { %v1434_v37 = vpop.f32.mrb[9].mxu1 }
 0x568   :  { %2574 = vmatprep.mubr.msk.f32.mxu1 %vm642_vm5, %v1434_v37  ;;  %v2202_v37 = vsub.f32 1.0, %v2967_v24 }
 0x569   :  { %2575 = vmatmul.mubr.msk.f32.vlgmr.msra.gmra.mrb[10].mxu1 %vm642_vm5, %v2536_v26 }
 0x62e   :  { %v2571_v50 = vpop.f32.mrb[8].mxu0 }
 0x62f   :  { %v2611_v53 = vadd.f32 %v2571_v50, %v1446_v48  ;;  %v2008_v52 = vpop.f32.mrb[9].mxu0 }
 0x630   :  { %v2612_v49 = vadd.f32 %v2008_v52, %v1446_v48 }
 0x631   :  { %v2111_v51 = vmul.f32 %v2611_v53, %v2923_v57  ;;  %v2135_v55 = vmul.f32 %v2611_v53, %v2933_v62  ;;  %v2159_v58 = vmul.f32 %v2611_v53, %v2945_v11 }
 0x632   :  { %v2110_v54 = vmul.f32 %v2612_v49, %v2935_v2  ;;  %v2134_v56 = vmul.f32 %v2612_v49, %v2927_v59  ;;  %v2158_v60 = vmul.f32 %v2612_v49, %v2938_v5 }
 0x633   :  { %2120 = vrot.lane.b32.xlu0 %v2111_v51, %s2711_s4 }
 0x634   :  { %2118 = vrot.lane.b32.xlu1 %v2110_v54, %s2711_s4 }
 0x637   :  { %2144 = vrot.lane.b32.xlu0 %v2135_v55, %s2708_s1  ;;  %v2248_v55 = vstv %s2371_s9 }
 0x638   :  { %2142 = vrot.lane.b32.xlu1 %v2134_v56, %s2708_s1 }
 0x63b   :  { %2168 = vrot.lane.b32.xlu0 %v2159_v58, %s2712_s5 }
 0x63c   :  { %v2576_v61 = vpop.f32.mrb[10].mxu1  ;;  %2166 = vrot.lane.b32.xlu1 %v2158_v60, %s2712_s5 }
 0x63d   :  { %v2613_v63 = vadd.f32 %v2576_v61, %v1446_v48  ;;  %v2089_v0 = vpop.f32.mrb[11].mxu1 }
 0x63e   :  { %v2614_v1 = vadd.f32 %v2089_v0, %v1446_v48 }
 0x63f   :  { %v2113_v3 = vmul.f32 %v2613_v63, %v2923_v57  ;;  %v2137_v6 = vmul.f32 %v2613_v63, %v2933_v62  ;;  %v2161_v8 = vmul.f32 %v2613_v63, %v2945_v11  ;;  %v2103_v62 = vmul.f32 %v2611_v53, %v2959_v29 }
 0x640   :  { %v2112_v4 = vmul.f32 %v2614_v1, %v2935_v2  ;;  %v2136_v7 = vmul.f32 %v2614_v1, %v2927_v59  ;;  %v2160_v9 = vmul.f32 %v2614_v1, %v2938_v5  ;;  %v2102_v2 = vmul.f32 %v2612_v49, %v2957_v28 }
 0x641   :  { %2124 = vrot.lane.b32.xlu0 %v2113_v3, %s2711_s4  ;;  %v2105_v12 = vmul.f32 %v2613_v63, %v2959_v29  ;;  %v2104_v22 = vmul.f32 %v2614_v1, %v2957_v28 }
 0x642   :  { %2122 = vrot.lane.b32.xlu1 %v2112_v4, %s2711_s4 }
 0x645   :  { %2148 = vrot.lane.b32.xlu0 %v2137_v6, %s2708_s1 }
 0x646   :  { %2146 = vrot.lane.b32.xlu1 %v2136_v7, %s2708_s1 }
 0x649   :  { %2172 = vrot.lane.b32.xlu0 %v2161_v8, %s2712_s5 }
 0x64a   :  { %2170 = vrot.lane.b32.xlu1 %v2160_v9, %s2712_s5 }
 0x64d   :  { %2188 = vrot.lane.b32.xlu0 %v2800_v23, %s2713_s2 }
 0x64e   :  { %2186 = vrot.lane.b32.xlu1 %v2793_v21, %s2713_s2 }
 0x651   :  { %2192 = vrot.lane.b32.xlu0 %v2830_v34, %s2713_s2 }
 0x652   :  { %2190 = vrot.lane.b32.xlu1 %v2825_v33, %s2713_s2 }
 0x6a5   :  { %v2121_v57 = vpop.permute.xlu0 %2120 }
 0x6a6   :  { %v2119_v59 = vpop.permute.xlu1 %2118  ;;  %v2131_v11 = vadd.f32 %v2121_v57, %v2103_v62 }
 0x6a7   :  { %v2130_v13 = vadd.f32 %v2119_v59, %v2102_v2  ;;  %v2238_v2 = vstv %s2237_s11 }
 0x6a9   :  { %v2145_v5 = vpop.permute.xlu0 %2144 }
 0x6aa   :  { %v2143_v10 = vpop.permute.xlu1 %2142  ;;  %v2155_v23 = vadd.f32 %v2145_v5, %v2131_v11 }
 0x6ab   :  { %v2154_v15 = vadd.f32 %v2143_v10, %v2130_v13 }
 0x6ad   :  { %v2169_v16 = vpop.permute.xlu0 %2168 }
 0x6ae   :  { %v2179_v21 = vadd.f32 %v2169_v16, %v2155_v23  ;;  %v2167_v17 = vpop.permute.xlu1 %2166 }
 0x6af   :  { %v2178_v18 = vadd.f32 %v2167_v17, %v2154_v15 }
 0x6b0   :  { %2681 = vtanh.f32 %v2179_v21 }
 0x6b1   :  { %2683 = vtanh.f32 %v2178_v18 }
 0x6b3   :  { %v2125_v34 = vpop.permute.xlu0 %2124 }
 0x6b4   :  { %v2123_v33 = vpop.permute.xlu1 %2122  ;;  %v2133_v30 = vadd.f32 %v2125_v34, %v2105_v12 }
 0x6b5   :  { %v2132_v32 = vadd.f32 %v2123_v33, %v2104_v22 }
 0x6b7   :  { %v2149_v27 = vpop.permute.xlu0 %2148 }
 0x6b8   :  { %v2147_v31 = vpop.permute.xlu1 %2146  ;;  %v2157_v36 = vadd.f32 %v2149_v27, %v2133_v30 }
 0x6b9   :  { %v2156_v39 = vadd.f32 %v2147_v31, %v2132_v32 }
 0x6ba   :  { %v2682_v35 = vpop.eup %2681 }
 0x6bb   :  { %v2684_v38 = vpop.eup %2683  ;;  %v2173_v40 = vpop.permute.xlu0 %2172  ;;  %2212 = vrot.lane.b32.xlu0 %v2682_v35, %s2713_s2 }
 0x6bc   :  { %v2181_v41 = vadd.f32 %v2173_v40, %v2157_v36  ;;  %v2171_v43 = vpop.permute.xlu1 %2170  ;;  %2210 = vrot.lane.b32.xlu1 %v2684_v38, %s2713_s2 }
 0x6bd   :  { %v2180_v44 = vadd.f32 %v2171_v43, %v2156_v39 }
 0x6be   :  { %2685 = vtanh.f32 %v2181_v41 }
 0x6bf   :  { %2687 = vtanh.f32 %v2180_v44  ;;  %v2189_v19 = vpop.permute.xlu0 %2188 }
 0x6c0   :  { %v2187_v46 = vpop.permute.xlu1 %2186  ;;  %v2199_v48 = vmul.f32 %v2965_v14, %v2189_v19  ;;  %v2205_v14 = vsub.f32 1.0, %v2985_v42 }
 0x6c1   :  { %v2198_v52 = vmul.f32 %v2967_v24, %v2187_v46  ;;  %v2204_v24 = vsub.f32 1.0, %v2993_v45 }
 0x6c3   :  { %v2193_v47 = vpop.permute.xlu0 %2192 }
 0x6c4   :  { %v2191_v20 = vpop.permute.xlu1 %2190  ;;  %v2201_v0 = vmul.f32 %v2985_v42, %v2193_v47 }
 0x6c5   :  { %v2200_v4 = vmul.f32 %v2993_v45, %v2191_v20  ;;  %v2235_v45 = vstv %s3123_s6 }
 0x6c8   :  { %v2686_v29 = vpop.eup %2685 }
 0x6c9   :  { %v2688_v28 = vpop.eup %2687  ;;  %2216 = vrot.lane.b32.xlu0 %v2686_v29, %s2713_s2 }
 0x6ca   :  { %2214 = vrot.lane.b32.xlu1 %v2688_v28, %s2713_s2 }
 0x72d   :  { %v2213_v26 = vpop.permute.xlu0 %2212 }
 0x72e   :  { %v2223_v50 = vmul.f32 %v2213_v26, %v2203_v25  ;;  %v2211_v53 = vpop.permute.xlu1 %2210 }
 0x72f   :  { %v2222_v49 = vmul.f32 %v2211_v53, %v2202_v37 }
 0x730   :  { %v2227_v51 = vadd.f32 %v2223_v50, %v2199_v48 }
 0x731   :  { %v2226_v54 = vadd.f32 %v2222_v49, %v2198_v52 }
 0x732   :  { %v2231_v56 = vmax.f32 %v2227_v51, 0.0  ;;  %2279 = vrot.lane.b32.xlu0 %v2227_v51, %s2711_s4 }
 0x733   :  { %v2230_v58 = vmax.f32 %v2226_v54, 0.0  ;;  %2277 = vrot.lane.b32.xlu1 %v2226_v54, %s2711_s4 }
 0x734   :  { %v2250_v60 = vmul.f32 %v2248_v55, %v2231_v56  ;;  %v2240_v42 = vmul.f32 %v2238_v2, %v2231_v56 }
 0x735   :  { %v2249_v61 = vmul.f32 %v2248_v55, %v2230_v58  ;;  %v2239_v11 = vmul.f32 %v2238_v2, %v2230_v58 }
 0x736   :  { %2259 = vrot.lane.b32.xlu0 %v2250_v60, %s2714_s10  ;;  %v2244_v13 = vadd.f32 %v2240_v42, %v2235_v45 }
 0x737   :  { %2257 = vrot.lane.b32.xlu1 %v2249_v61, %s2714_s10  ;;  %v2243_v15 = vadd.f32 %v2239_v11, %v2235_v45 }
 0x73b   :  { %v2217_v63 = vpop.permute.xlu0 %2216 }
 0x73c   :  { %v2225_v1 = vmul.f32 %v2217_v63, %v2205_v14  ;;  %v2215_v3 = vpop.permute.xlu1 %2214 }
 0x73d   :  { %v2224_v6 = vmul.f32 %v2215_v3, %v2204_v24 }
 0x73e   :  { %v2229_v7 = vadd.f32 %v2225_v1, %v2201_v0 }
 0x73f   :  { %v2228_v8 = vadd.f32 %v2224_v6, %v2200_v4 }
 0x740   :  { %v2233_v9 = vmax.f32 %v2229_v7, 0.0 }
 0x741   :  { %v2232_v57 = vmax.f32 %v2228_v8, 0.0 }
 0x742   :  { %v2252_v59 = vmul.f32 %v2248_v55, %v2233_v9  ;;  %v2242_v18 = vmul.f32 %v2238_v2, %v2233_v9 }
 0x743   :  { %v2251_v62 = vmul.f32 %v2248_v55, %v2232_v57  ;;  %v2241_v34 = vmul.f32 %v2238_v2, %v2232_v57 }
 0x744   :  { %2263 = vrot.lane.b32.xlu0 %v2252_v59, %s2714_s10  ;;  %v2246_v22 = vadd.f32 %v2242_v18, %v2235_v45 }
 0x745   :  { %2261 = vrot.lane.b32.xlu1 %v2251_v62, %s2714_s10  ;;  %v2245_v27 = vadd.f32 %v2241_v34, %v2235_v45 }
 0x748   :  { %2283 = vrot.lane.b32.xlu0 %v2229_v7, %s2711_s4 }
 0x749   :  { %2281 = vrot.lane.b32.xlu1 %v2228_v8, %s2711_s4 }
 0x7a4   :  { %v2280_v5 = vpop.permute.xlu0 %2279 }
 0x7a5   :  { %2290 = vst.msk [vmem:[%s3124_s7 + $0x8] sm:$0xff] %vm642_vm5, %v2280_v5  ;;  %v2278_v10 = vpop.permute.xlu1 %2277 }
 0x7a6   :  { %2289 = vst.msk [vmem:[%s3124_s7] sm:$0xff] %vm642_vm5, %v2278_v10 }
 0x7a8   :  { %v2260_v23 = vpop.permute.xlu0 %2259 }
 0x7a9   :  { %v2270_v16 = vadd.f32 %v2260_v23, %v2244_v13  ;;  %v2258_v21 = vpop.permute.xlu1 %2257 }
 0x7aa   :  { %v2269_v17 = vadd.f32 %v2258_v21, %v2243_v15 }
 0x7ab   :  { %2295 = vst.msk [vmem:[%s3124_s7 + $0x8] sm:$0xff] %vm2293_vm6, %v2270_v16 }
 0x7ac   :  { %2294 = vst.msk [vmem:[%s3124_s7] sm:$0xff] %vm2293_vm6, %v2269_v17 }
 0x7b6   :  { %v2264_v33 = vpop.permute.xlu0 %2263 }
 0x7b7   :  { %v2262_v12 = vpop.permute.xlu1 %2261  ;;  %v2272_v30 = vadd.f32 %v2264_v33, %v2246_v22 }
 0x7b8   :  { %v2271_v32 = vadd.f32 %v2262_v12, %v2245_v27 }
 0x7ba   :  { %v2284_v31 = vpop.permute.xlu0 %2283 }
 0x7bb   :  { %2292 = vst.msk [vmem:[%s3124_s7 + $0x18] sm:$0xff] %vm642_vm5, %v2284_v31  ;;  %v2282_v35 = vpop.permute.xlu1 %2281 }
 0x7bc   :  { %2297 = vst.msk [vmem:[%s3124_s7 + $0x18] sm:$0xff] %vm2293_vm6, %v2272_v30 }
 0x7bd   :  { %2291 = vst.msk [vmem:[%s3124_s7 + $0x10] sm:$0xff] %vm642_vm5, %v2282_v35 }
 0x7be   :  { %2296 = vst.msk [vmem:[%s3124_s7 + $0x10] sm:$0xff] %vm2293_vm6, %v2271_v32 }
 0x7bf   :  { %2302 = vsyncpa [#allocation4], 1 }

</bundles_post_ra>
